<compile_context>
chip_gen: v7x
topology: tpu7x:2x2x1
jax: 0.10.0
libtpu: 0.0.40
codegen_flags: <defaults>
</compile_context>

<pallas_src>
import functools

import numpy as np
import jax
import jax.numpy as jnp
from jax import lax
from jax.experimental import pallas as pl
from jax.experimental.pallas import tpu as pltpu

EPS = 1e-5


def _cdiv(a, b):
    return -(-a // b)


def _round_up(x, m):
    return _cdiv(x, m) * m


def _build_vad_tables(label_vads):
    """numpy: per-VAD-dim argsort indices + distance vectors (mirrors the module)."""
    label_vads = np.asarray(label_vads, np.float32)          # (N, 3)
    sorted_idxs, dists = [], []
    for k in range(3):
        idx = np.argsort(label_vads[:, k])
        vals = label_vads[idx, k].astype(np.float32)
        dv = np.roll(vals, -1) - vals
        for i in range(len(dv)):
            if dv[i] == 0:
                assert i != len(dv) - 1
                dv[i] = dv[i + 1]
        dv[-1] = 0.0
        sorted_idxs.append(idx)
        dists.append(dv)
    return (np.stack(sorted_idxs).astype(np.int32),          # (3, N)
            np.stack(dists).astype(np.float32))               # (3, N)


def _build_host_constants(sorted_idxs, dists, label_type):
    """Tiny VMEM-resident constants encoding the per-head (segmented) structure."""
    n = dists.shape[1]
    w = 3 * n
    head = np.repeat(np.arange(3), n)                          # head id per lane
    within = np.tile(np.arange(n), 3)                          # within-head lane index

    tables = np.zeros((6, w), np.float32)
    tables[0] = dists.reshape(-1)                              # row 0: distance vector
    tables[1] = within                                         # row 1: within-head index
    for h in range(3):
        tables[2 + h] = (head == h)                            # rows 2-4: head masks
    tables[5] = 1.0 / 3.0                                      # row 5: mean-over-heads

    same = head[:, None] == head[None, :]
    col = np.arange(w)
    tri = (same & (col[:, None] <= col[None, :])).astype(np.float32)   # segmented cumsum
    seg = same.astype(np.float32)                                       # segmented sum

    if label_type == 'single':
        inv = np.empty((3, n), np.int32)
        for h in range(3):
            inv[h, sorted_idxs[h]] = np.arange(n, dtype=np.int32)
        aux = np.ascontiguousarray(inv.T)                      # (N, 3): sorted position
    else:
        aux = np.zeros((n, w), np.float32)                     # (N, 3N): gather matrix
        for h in range(3):
            aux[sorted_idxs[h], h * n + np.arange(n)] = 1.0
    return tables, tri, seg, aux


def _emd_kernel(*refs, label_type, n_labels, inv_n, exact_recip):
    """Per-batch-tile EMD loss.

    'single': refs = (logits (tb,3N), pos (tb,3), tables (6,3N), seg (3N,3N),
                      tri (3N,3N), out (1,tb))
    'multi' : refs = (logits (tb,3N), labels (tb,N), perm (N,3N), tables (6,3N),
                      seg (3N,3N), tri (3N,3N), out (1,tb))
    """
    n = n_labels
    if label_type == 'single':
        logits_ref, pos_ref, tab_ref, seg_ref, tri_ref, out_ref = refs
    else:
        logits_ref, lab_ref, perm_ref, tab_ref, seg_ref, tri_ref, out_ref = refs

    def recip(v):
        return (1.0 / v) if exact_recip else pl.reciprocal(v, approx=True)

    x = logits_ref[...].astype(jnp.float32)                    # (tb, 3N) upcast in-kernel
    dist = tab_ref[0:1, :]                                     # (1, 3N)
    red = tab_ref[5:6, :]                                      # (1, 3N) == 1/3

    if label_type == 'single':
        within = tab_ref[1:2, :]
        masks = [tab_ref[2 + h:3 + h, :] for h in range(3)]    # (1, 3N) head masks
        # Exact per-head max (three static lane slices, XLU), broadcast via masks.
        m = masks[0] * jnp.max(x[:, 0:n], axis=-1, keepdims=True)
        m = m + masks[1] * jnp.max(x[:, n:2 * n], axis=-1, keepdims=True)
        m = m + masks[2] * jnp.max(x[:, 2 * n:3 * n], axis=-1, keepdims=True)
        e = jnp.exp(x - m)
        # Per-head softmax denominator, broadcast back, in one tiny MXU matmul.
        denom = jnp.dot(e, seg_ref[...], preferred_element_type=jnp.float32)
        p = e * recip(denom)
        # Rebuild the per-head one-hot labels from sorted positions (no label DMA).
        pos = pos_ref[...].astype(jnp.float32)                 # (tb, 3)
        pos_b = (masks[0] * pos[:, 0:1] + masks[1] * pos[:, 1:2]
                 + masks[2] * pos[:, 2:3])                     # (tb, 3N)
        y = (within == pos_b).astype(jnp.float32)
        # softmax and one-hot both sum to 1 -> renormalization is a scalar scale.
        scale = 1.0 / (1.0 + EPS)
        pn = p * scale
        yn = y * scale
    else:
        p = recip(1.0 + jnp.exp(-x))                           # sigmoid
        lab = lab_ref[...].astype(jnp.float32)                 # (tb, N)
        # Per-head sorted-label gather as a permutation matmul (exact for 0/1).
        y = jnp.dot(lab, perm_ref[...], preferred_element_type=jnp.float32)
        psum = jnp.dot(p, seg_ref[...], preferred_element_type=jnp.float32)
        ysum = jnp.sum(lab, axis=-1, keepdims=True)            # permutation-invariant
        pn = p * recip(psum + EPS)
        yn = y * recip(ysum + EPS)

    # Segmented (per-head) cumsum difference as ONE MXU matmul, shared by all heads.
    c = jnp.dot(pn - yn, tri_ref[...], preferred_element_type=jnp.float32)
    # inter-EMD (distance-weighted squared CDF diff) + intra-EMD (mean sq. diff).
    w = jnp.square(c) * dist + jnp.square(p - y) * inv_n       # (tb, 3N)
    # Lane reduction + mean over heads as one MXU dot -> lane-dense (1, tb) output.
    out_ref[...] = lax.dot_general(red, w, (((1,), (1,)), ((), ())),
                                   preferred_element_type=jnp.float32)


def emd_loss_forward(logits, labels, *, label_vads, label_type='single',
                     block_b=512, exact_reciprocal=False):
    """EMD loss forward.

    logits : (B, 3*N) float  — [v_logits | a_logits | d_logits]
    labels : (B,) int for 'single', (B, N) multi-hot float for 'multi'
    returns: (B,) float32 per-example loss
    """
    assert label_type in ('single', 'multi')
    sorted_idxs, dists = _build_vad_tables(label_vads)
    N = int(sorted_idxs.shape[1])
    width = 3 * N
    B = int(logits.shape[0])
    assert int(logits.shape[1]) == width
    inv_n = 1.0 / N

    # Batch tiling: single full block when B <= block_b (no padding, no partial
    # blocks); otherwise >=2 tiles (both v7x TensorCores stay busy) with tb a
    # multiple of 128 so output blocks stay lane-dense.
    if B <= block_b:
        tb = B
    else:
        ntiles = max(2, _cdiv(B, block_b))
        tb = _round_up(_cdiv(B, ntiles), 128)
    grid_b = _cdiv(B, tb)
    b_pad = grid_b * tb

    tables_np, tri_np, seg_np, aux_np = _build_host_constants(
        sorted_idxs, dists, label_type)
    tables_c = jnp.asarray(tables_np)
    tri_c = jnp.asarray(tri_np)
    seg_c = jnp.asarray(seg_np)
    aux_c = jnp.asarray(aux_np)

    kernel = functools.partial(_emd_kernel, label_type=label_type, n_labels=N,
                               inv_n=inv_n, exact_recip=exact_reciprocal)

    batched_spec = lambda last: pl.BlockSpec((tb, last), lambda i: (i, 0))
    resident_spec = lambda s: pl.BlockSpec(s, lambda i: (0, 0))

    @jax.jit
    def _run(logits, labels):
        lg = logits                                             # keep caller dtype on the wire
        if label_type == 'single':
            pos = aux_c[labels].astype(jnp.float32)             # (B, 3) sorted positions
            aux_in = pos
            aux_spec = batched_spec(3)
            extra_ins, extra_specs = (), ()
        else:
            lab = labels
            if not jnp.issubdtype(lab.dtype, jnp.floating):
                lab = lab.astype(jnp.float32)
            aux_in = lab                                        # (B, N)
            aux_spec = batched_spec(N)
            extra_ins = (aux_c,)                                # (N, 3N) gather matrix
            extra_specs = (resident_spec((N, width)),)

        if b_pad != B:                                          # rare ragged multi-tile case
            pad = b_pad - B
            lg = jnp.pad(lg, ((0, pad), (0, 0)))
            aux_in = jnp.pad(aux_in, ((0, pad), (0, 0)))

        out = pl.pallas_call(
            kernel,
            out_shape=jax.ShapeDtypeStruct((1, b_pad), jnp.float32),
            grid=(grid_b,),
            in_specs=[
                batched_spec(width),                            # logits tile (tb, 3N)
                aux_spec,                                       # pos / labels tile
                *extra_specs,                                   # perm matrix ('multi')
                resident_spec((6, width)),                      # lane tables (resident)
                resident_spec((width, width)),                  # same-head sum matrix
                resident_spec((width, width)),                  # segmented upper-tri
            ],
            out_specs=pl.BlockSpec((1, tb), lambda i: (0, i)),  # lane-dense loss row
            compiler_params=pltpu.CompilerParams(
                dimension_semantics=("parallel",)),
        )(lg, aux_in, *extra_ins, tables_c, seg_c, tri_c)
        return out[0, :B]

    return _run(jnp.asarray(logits), jnp.asarray(labels))


def emd_loss_ref(logits, labels, label_vads, label_type='single', eps=1e-5):
    """Pure-numpy reference mirroring the PyTorch module (use_emd=True)."""
    logits = np.asarray(logits, np.float32)
    sorted_idxs, dists = _build_vad_tables(label_vads)
    N = sorted_idxs.shape[1]
    if label_type == 'single':
        lab = np.eye(N, dtype=np.float32)[np.asarray(labels)]
    else:
        lab = np.asarray(labels, np.float32)
    losses = []
    for k in range(3):
        logit = logits[:, k * N:(k + 1) * N]
        y = lab[:, sorted_idxs[k]]
        d = dists[k]
        if label_type == 'single':
            e = np.exp(logit - logit.max(axis=1, keepdims=True))
            p = e / e.sum(axis=1, keepdims=True)
        else:
            p = 1.0 / (1.0 + np.exp(-logit))
        intra = np.square(p - y).sum(axis=1) / N
        pn = p / (p.sum(axis=1, keepdims=True) + eps)
        yn = y / (y.sum(axis=1, keepdims=True) + eps)
        c = np.cumsum(pn, axis=1) - np.cumsum(yn, axis=1)
        inter = (np.square(c) * d[None, :]).sum(axis=1)
        losses.append(inter + intra)
    return np.stack(losses, axis=1).mean(axis=1)


if __name__ == "__main__":
    N = 8                                   # number of categorical labels
    rng = np.random.RandomState(0)
    label_VAD = [tuple(map(float, v)) for v in rng.uniform(0.0, 1.0, size=(N, 3))]

    key = jax.random.PRNGKey(0)
    k1, k2, k3, k4 = jax.random.split(key, 4)

    # --- 'single' (softmax + integer labels, one-hot rebuilt in-kernel) ---
    B = 4
    logits_s = jax.random.normal(k1, (B, 3 * N), dtype=jnp.float32)
    labels_s = jax.random.randint(k2, (B,), 0, N)
    out_s = jax.block_until_ready(
        emd_loss_forward(logits_s, labels_s, label_vads=label_VAD,
                         label_type='single'))
    ref_s = emd_loss_ref(np.asarray(logits_s), np.asarray(labels_s),
                         label_VAD, 'single')
    np.testing.assert_allclose(np.asarray(out_s), ref_s, rtol=2e-2, atol=2e-4)

    # --- 'multi' (sigmoid + multi-hot labels) ---
    B2 = 5
    logits_m = jax.random.normal(k3, (B2, 3 * N), dtype=jnp.float32)
    labels_m = (jax.random.uniform(k4, (B2, N)) > 0.5).astype(jnp.float32)
    out_m = jax.block_until_ready(
        emd_loss_forward(logits_m, labels_m, label_vads=label_VAD,
                         label_type='multi'))
    ref_m = emd_loss_ref(np.asarray(logits_m), np.asarray(labels_m),
                         label_VAD, 'multi')
    np.testing.assert_allclose(np.asarray(out_m), ref_m, rtol=2e-2, atol=2e-4)

    print("KERNEL_OK")
</pallas_src>

<mosaic_0001>
module attributes {stable_mosaic.version = 11 : i64} {
  func.func @_emd_kernel(%arg0: i32, %arg1: memref<4x24xf32, #tpu.memory_space<vmem>>, %arg2: memref<4x3xf32, #tpu.memory_space<vmem>>, %arg3: memref<6x24xf32, #tpu.memory_space<vmem>>, %arg4: memref<24x24xf32, #tpu.memory_space<vmem>>, %arg5: memref<24x24xf32, #tpu.memory_space<vmem>>, %arg6: memref<1x4xf32, #tpu.memory_space<vmem>>) attributes {dimension_semantics = [#tpu.dimension_semantics<parallel>], iteration_bounds = array<i64: 1>, scalar_prefetch = 0 : i64, scratch_operands = 0 : i64, tpu.core_type = #tpu.core_type<tc>, window_params = [{transform_indices = @transform_0, window_bounds = array<i64: 4, 24>}, {transform_indices = @transform_1, window_bounds = array<i64: 4, 3>}, {pipeline_mode = #tpu.pipeline_mode<synchronous>, transform_indices = @transform_2, window_bounds = array<i64: 6, 24>}, {pipeline_mode = #tpu.pipeline_mode<synchronous>, transform_indices = @transform_3, window_bounds = array<i64: 24, 24>}, {pipeline_mode = #tpu.pipeline_mode<synchronous>, transform_indices = @transform_4, window_bounds = array<i64: 24, 24>}, {transform_indices = @transform_5, window_bounds = array<i64: 1, 4>}]} {
    %c0 = arith.constant 0 : index
    %c0_0 = arith.constant 0 : index
    %0 = vector.load %arg1[%c0, %c0_0] : memref<4x24xf32, #tpu.memory_space<vmem>>, vector<4x24xf32>
    %c0_1 = arith.constant 0 : index
    %c0_2 = arith.constant 0 : index
    %1 = vector.load %arg3[%c0_1, %c0_2] : memref<6x24xf32, #tpu.memory_space<vmem>>, vector<1x24xf32>
    %c5 = arith.constant 5 : index
    %c0_3 = arith.constant 0 : index
    %2 = vector.load %arg3[%c5, %c0_3] : memref<6x24xf32, #tpu.memory_space<vmem>>, vector<1x24xf32>
    %c1 = arith.constant 1 : index
    %c0_4 = arith.constant 0 : index
    %3 = vector.load %arg3[%c1, %c0_4] : memref<6x24xf32, #tpu.memory_space<vmem>>, vector<1x24xf32>
    %c2 = arith.constant 2 : index
    %c0_5 = arith.constant 0 : index
    %4 = vector.load %arg3[%c2, %c0_5] : memref<6x24xf32, #tpu.memory_space<vmem>>, vector<1x24xf32>
    %c3 = arith.constant 3 : index
    %c0_6 = arith.constant 0 : index
    %5 = vector.load %arg3[%c3, %c0_6] : memref<6x24xf32, #tpu.memory_space<vmem>>, vector<1x24xf32>
    %c4 = arith.constant 4 : index
    %c0_7 = arith.constant 0 : index
    %6 = vector.load %arg3[%c4, %c0_7] : memref<6x24xf32, #tpu.memory_space<vmem>>, vector<1x24xf32>
    %7 = vector.extract_strided_slice %0 {offsets = [0, 0], sizes = [4, 8], strides = [1, 1]} : vector<4x24xf32> to vector<4x8xf32>
    %cst = arith.constant dense<0xFF800000> : vector<4xf32>
    %8 = vector.multi_reduction <maximumf>, %7, %cst [1] : vector<4x8xf32> to vector<4xf32>
    %9 = vector.shape_cast %8 : vector<4xf32> to vector<4x1xf32>
    %10 = vector.broadcast %4 : vector<1x24xf32> to vector<4x24xf32>
    %11 = vector.broadcast %9 : vector<4x1xf32> to vector<4x24xf32>
    %12 = arith.mulf %10, %11 : vector<4x24xf32>
    %13 = vector.extract_strided_slice %0 {offsets = [0, 8], sizes = [4, 8], strides = [1, 1]} : vector<4x24xf32> to vector<4x8xf32>
    %cst_8 = arith.constant dense<0xFF800000> : vector<4xf32>
    %14 = vector.multi_reduction <maximumf>, %13, %cst_8 [1] : vector<4x8xf32> to vector<4xf32>
    %15 = vector.shape_cast %14 : vector<4xf32> to vector<4x1xf32>
    %16 = vector.broadcast %5 : vector<1x24xf32> to vector<4x24xf32>
    %17 = vector.broadcast %15 : vector<4x1xf32> to vector<4x24xf32>
    %18 = arith.mulf %16, %17 : vector<4x24xf32>
    %19 = arith.addf %12, %18 : vector<4x24xf32>
    %20 = vector.extract_strided_slice %0 {offsets = [0, 16], sizes = [4, 8], strides = [1, 1]} : vector<4x24xf32> to vector<4x8xf32>
    %cst_9 = arith.constant dense<0xFF800000> : vector<4xf32>
    %21 = vector.multi_reduction <maximumf>, %20, %cst_9 [1] : vector<4x8xf32> to vector<4xf32>
    %22 = vector.shape_cast %21 : vector<4xf32> to vector<4x1xf32>
    %23 = vector.broadcast %6 : vector<1x24xf32> to vector<4x24xf32>
    %24 = vector.broadcast %22 : vector<4x1xf32> to vector<4x24xf32>
    %25 = arith.mulf %23, %24 : vector<4x24xf32>
    %26 = arith.addf %19, %25 : vector<4x24xf32>
    %27 = arith.subf %0, %26 : vector<4x24xf32>
    %28 = math.exp %27 : vector<4x24xf32>
    %c0_10 = arith.constant 0 : index
    %c0_11 = arith.constant 0 : index
    %29 = vector.load %arg4[%c0_10, %c0_11] : memref<24x24xf32, #tpu.memory_space<vmem>>, vector<24x24xf32>
    %cst_12 = arith.constant dense<0.000000e+00> : vector<4x24xf32>
    %30 = tpu.matmul %28, %29, %cst_12 {dimension_numbers = #tpu.dot_dimension_numbers<[1], [0], [0], [1], [0, 0, 1, 1], [], []>} : vector<4x24xf32>, vector<24x24xf32>, vector<4x24xf32> -> vector<4x24xf32>
    %31 = tpu.reciprocal %30 {approx = true} : vector<4x24xf32> -> vector<4x24xf32>
    %32 = arith.mulf %28, %31 : vector<4x24xf32>
    %c0_13 = arith.constant 0 : index
    %c0_14 = arith.constant 0 : index
    %33 = vector.load %arg2[%c0_13, %c0_14] : memref<4x3xf32, #tpu.memory_space<vmem>>, vector<4x3xf32>
    %34 = vector.extract_strided_slice %33 {offsets = [0, 0], sizes = [4, 1], strides = [1, 1]} : vector<4x3xf32> to vector<4x1xf32>
    %35 = vector.broadcast %4 : vector<1x24xf32> to vector<4x24xf32>
    %36 = vector.broadcast %34 : vector<4x1xf32> to vector<4x24xf32>
    %37 = arith.mulf %35, %36 : vector<4x24xf32>
    %38 = vector.extract_strided_slice %33 {offsets = [0, 1], sizes = [4, 1], strides = [1, 1]} : vector<4x3xf32> to vector<4x1xf32>
    %39 = vector.broadcast %5 : vector<1x24xf32> to vector<4x24xf32>
    %40 = vector.broadcast %38 : vector<4x1xf32> to vector<4x24xf32>
    %41 = arith.mulf %39, %40 : vector<4x24xf32>
    %42 = arith.addf %37, %41 : vector<4x24xf32>
    %43 = vector.extract_strided_slice %33 {offsets = [0, 2], sizes = [4, 1], strides = [1, 1]} : vector<4x3xf32> to vector<4x1xf32>
    %44 = vector.broadcast %6 : vector<1x24xf32> to vector<4x24xf32>
    %45 = vector.broadcast %43 : vector<4x1xf32> to vector<4x24xf32>
    %46 = arith.mulf %44, %45 : vector<4x24xf32>
    %47 = arith.addf %42, %46 : vector<4x24xf32>
    %48 = vector.broadcast %3 : vector<1x24xf32> to vector<4x24xf32>
    %49 = arith.cmpf oeq, %48, %47 : vector<4x24xf32>
    %50 = arith.extui %49 : vector<4x24xi1> to vector<4x24xi32>
    %51 = arith.sitofp %50 : vector<4x24xi32> to vector<4x24xf32>
    %cst_15 = arith.constant 0.999989986 : f32
    %52 = vector.broadcast %cst_15 : f32 to vector<4x24xf32>
    %53 = arith.mulf %32, %52 : vector<4x24xf32>
    %cst_16 = arith.constant 0.999989986 : f32
    %54 = vector.broadcast %cst_16 : f32 to vector<4x24xf32>
    %55 = arith.mulf %51, %54 : vector<4x24xf32>
    %56 = arith.subf %53, %55 : vector<4x24xf32>
    %c0_17 = arith.constant 0 : index
    %c0_18 = arith.constant 0 : index
    %57 = vector.load %arg5[%c0_17, %c0_18] : memref<24x24xf32, #tpu.memory_space<vmem>>, vector<24x24xf32>
    %cst_19 = arith.constant dense<0.000000e+00> : vector<4x24xf32>
    %58 = tpu.matmul %56, %57, %cst_19 {dimension_numbers = #tpu.dot_dimension_numbers<[1], [0], [0], [1], [0, 0, 1, 1], [], []>} : vector<4x24xf32>, vector<24x24xf32>, vector<4x24xf32> -> vector<4x24xf32>
    %59 = arith.mulf %58, %58 : vector<4x24xf32>
    %60 = vector.broadcast %1 : vector<1x24xf32> to vector<4x24xf32>
    %61 = arith.mulf %59, %60 : vector<4x24xf32>
    %62 = arith.subf %32, %51 : vector<4x24xf32>
    %63 = arith.mulf %62, %62 : vector<4x24xf32>
    %cst_20 = arith.constant 1.250000e-01 : f32
    %64 = vector.broadcast %cst_20 : f32 to vector<4x24xf32>
    %65 = arith.mulf %63, %64 : vector<4x24xf32>
    %66 = arith.addf %61, %65 : vector<4x24xf32>
    %cst_21 = arith.constant dense<0.000000e+00> : vector<1x4xf32>
    %67 = tpu.matmul %2, %66, %cst_21 {dimension_numbers = #tpu.dot_dimension_numbers<[1], [1], [0], [0], [0, 0, 1, 0], [], []>} : vector<1x24xf32>, vector<4x24xf32>, vector<1x4xf32> -> vector<1x4xf32>
    %c0_22 = arith.constant 0 : index
    %c0_23 = arith.constant 0 : index
    %68 = vector.load %arg6[%c0_22, %c0_23] : memref<1x4xf32, #tpu.memory_space<vmem>>, vector<1x4xf32>
    tpu.vector_store %arg6[%c0_22, %c0_23], %67 {strides = array<i32>} : memref<1x4xf32, #tpu.memory_space<vmem>>, vector<1x4xf32>,
    return
  }
  func.func @transform_0(%arg0: i32) -> (i32, i32) {
    %c0_i32 = arith.constant 0 : i32
    %c0_i32_0 = arith.constant 0 : i32
    return %arg0, %c0_i32 : i32, i32
  }
  func.func @transform_1(%arg0: i32) -> (i32, i32) {
    %c0_i32 = arith.constant 0 : i32
    %c0_i32_0 = arith.constant 0 : i32
    return %arg0, %c0_i32 : i32, i32
  }
  func.func @transform_2(%arg0: i32) -> (i32, i32) {
    %c0_i32 = arith.constant 0 : i32
    %c0_i32_0 = arith.constant 0 : i32
    %c0_i32_1 = arith.constant 0 : i32
    return %c0_i32, %c0_i32_0 : i32, i32
  }
  func.func @transform_3(%arg0: i32) -> (i32, i32) {
    %c0_i32 = arith.constant 0 : i32
    %c0_i32_0 = arith.constant 0 : i32
    %c0_i32_1 = arith.constant 0 : i32
    return %c0_i32, %c0_i32_0 : i32, i32
  }
  func.func @transform_4(%arg0: i32) -> (i32, i32) {
    %c0_i32 = arith.constant 0 : i32
    %c0_i32_0 = arith.constant 0 : i32
    %c0_i32_1 = arith.constant 0 : i32
    return %c0_i32, %c0_i32_0 : i32, i32
  }
  func.func @transform_5(%arg0: i32) -> (i32, i32) {
    %c0_i32 = arith.constant 0 : i32
    %c0_i32_0 = arith.constant 0 : i32
    return %c0_i32, %arg0 : i32, i32
  }
}

</mosaic_0001>

<bundles_post_ra>
// kernel: _run.1
= control target key start
LH: loop header
LB: loop body
LE: loop exit
PB: predicated region body
PF: predicated region fallthrough
CT: control target
= control target key end

     0   :  { %10 = vsyncpa [#allocation3], 0  ;;  %s580_s0 = inlined_call_operand.hbm [shape: f32[4,24], index: 0, kind: input, shape index: {}]   ;;  %s581_s1 = inlined_call_operand.vmem [shape: f32[4,3], index: 1, kind: input, shape index: {}]   ;;  %s582_s2 = inlined_call_operand.vmem [shape: f32[6,24], index: 2, kind: input, shape index: {}]   ;;  %s583_s3 = inlined_call_operand.vmem [shape: f32[24,24], index: 3, kind: input, shape index: {}]   ;;  %s584_s4 = inlined_call_operand.vmem [shape: f32[24,24], index: 4, kind: input, shape index: {}]   ;;  %s585_s5 = inlined_call_operand.hbm [shape: f32[1,4], index: 5, kind: output, shape index: {}]  }
   0x1   :  { %11 = vsyncpa [#allocation4], 0  ;;  %s472_s18 = smov [#allocation2]   ;;  %s424_s22 = scalar_lea.hbm %s580_s0, 64 }
   0x2   :  { %s18_s19 = sshll.u32 %s472_s18, 4  ;;  %p425_p0 = scmp.ne.s32.totalorder %s580_s0, %s424_s22  ;;  %s19_s19 = int_to_ptr.vmem [resolvable:$true] %s18_s19 }
   0x3   :  { %p428_p1 = scmp.lt.u32.totalorder %s424_s22, %s580_s0 }
   0x5   :  { %p430_p2 = pnand %p428_p1, %p425_p0 }
   0x7   :  { %433 = shalt.err (!%p430_p2)
}
   0x8   :  { %s434_s27 = scalar_lea.vmem %s19_s19, 64  ;;  %p439_p4 = scmp.lt.s32.totalorder %s19_s19, %s19_s19 }
   0x9   :  { %p435_p3 = scmp.ne.s32.totalorder %s19_s19, %s434_s27  ;;  %p440_p5 = scmp.lt.s32.totalorder %s434_s27, %s434_s27 }
   0xb   :  { %p441_p6 = por %p440_p5, %p439_p4 }
   0xd   :  { %p442_p7 = pnand %p441_p6, %p435_p3 }
   0xf   :  { %445 = shalt.err (!%p442_p7)
}
  0x10   :  { %21 = dma.hbm_to_vmem [thread:$0]  %s580_s0, 64, %s19_s19, [#allocation3]  }
  0x11   :  { %468 = dma.done.wait [#allocation3], 64  }
  0x12   :  { %469 = vsyncadd [#allocation3], 4294967232  ;;  %vm40_vm0 = vcmask 60416   ;;  %vm59_vm1 = vcmask 191616   ;;  %v33_v0 = vld [vmem:[#allocation2] sm:$0xf] }
  0x13   :  { %vm49_vm2 = vcmask 126016   ;;  %v41_v1 = vsel %vm40_vm0, %v33_v0, -inf  ;;  %v60_v2 = vsel %vm59_vm1, %v33_v0, -inf  ;;  %v72_v4 = vld [vmem:[%s583_s3] sm:$0xff]  ;;  %v73_v5 = vld [vmem:[%s583_s3 + $0x8] sm:$0xff]  ;;  %v473_v6 = vmov 0.0|0.0  }
  0x14   :  { %42 = vmax.xlane.f32.xlu0 %v41_v1  ;;  %61 = vmax.xlane.f32.xlu1 %v60_v2  ;;  %v50_v3 = vsel %vm49_vm2, %v33_v0, -inf  ;;  %v403_v7 = vpack.c.bf16 %v73_v5, %v72_v4  ;;  %vm474_vm3 = vmmov 0   ;;  %v475_v8 = vmov 0.0   ;;  %v74_v9 = vld [vmem:[%s583_s3 + $0x10] sm:$0xff]  ;;  %v151_v10 = vld [vmem:[%s581_s1] sm:$0xf] }
  0x15   :  { %402 = vmatprep.subr.bf16.mxu0 %v473_v6  ;;  %385 = vmatprep.mubr.msk.f32.mxu0 %vm474_vm3, %v475_v8  ;;  %v476_v11 = vmov 0   ;;  %v477_v12 = vmov 1   ;;  %v478_v13 = vmov 2   ;;  %v359_v15 = vld [vmem:[%s582_s2 + $0x2] ss:$0 sm:$0xff]  ;;  %vm75_vm4 = vcmask 195584  }
  0x16   :  { %405 = vmatprep.subr.bf16.mxu1 %v473_v6  ;;  %394 = vmatprep.mubr.msk.f32.mxu1 %vm474_vm3, %v475_v8  ;;  %v360_v16 = vld [vmem:[%s582_s2 + $0x3] ss:$0 sm:$0xff]  ;;  %v361_v17 = vld [vmem:[%s582_s2 + $0x4] ss:$0 sm:$0xff]  ;;  %v181_v29 = vld [vmem:[%s584_s4 + $0x8] sm:$0xff]  ;;  %s479_s27 = smov [#allocation5]  }
  0x17   :  { %404 = vmatpush3.bf16.msra.mxu0 %v403_v7  ;;  %416 = vset.pattern.permute.xlu1 %v476_v11  ;;  %v180_v28 = vld [vmem:[%s584_s4] sm:$0xff]  ;;  %v182_v31 = vld [vmem:[%s584_s4 + $0x10] sm:$0xff]  ;;  %s350_s28 = sshll.u32 %s479_s27, 4  ;;  %vm342_vm6 = vcmask 24576   ;;  %s351_s28 = int_to_ptr.vmem [resolvable:$true] %s350_s28 }
  0x18   :  { %51 = vmax.xlane.f32.xlu0 %v50_v3  ;;  %383 = vmatprep.subr.mxu0 %v475_v8  ;;  %v406_v30 = vpack.c.bf16 %v181_v29, %v180_v28  ;;  %v363_v42 = vld [vmem:[%s582_s2 + $0x1] ss:$0 sm:$0xff]  ;;  %v366_v51 = vld [vmem:[%s582_s2] ss:$0 sm:$0xff]  ;;  %v35_v58 = vld [vmem:[%s582_s2 + $0x5] sm:$0x1]  ;;  %p451_p9 = scmp.lt.s32.totalorder %s351_s28, %s351_s28 }
  0x19   :  { %417 = vset.pattern.permute.xlu0 %v477_v12  ;;  %s446_s29 = scalar_lea.vmem %s351_s28, 16  ;;  %s450_s30 = scalar_lea.vmem %s351_s28, 32 }
  0x1a   :  { %407 = vmatpush3.bf16.msra.mxu1 %v406_v30  ;;  %p447_p8 = scmp.ne.s32.totalorder %s351_s28, %s446_s29  ;;  %p452_p10 = scmp.lt.s32.totalorder %s450_s30, %s446_s29 }
  0x1b   :  { %384 = vmatpush3.msra.mxu0 %v74_v9  ;;  %392 = vmatprep.subr.mxu1 %v475_v8 }
  0x1c   :  { %397 = vmatprep.subr.mxu0 %v475_v8  ;;  %p453_p11 = por %p452_p10, %p451_p9 }
  0x1e   :  { %393 = vmatpush3.msra.mxu1 %v182_v31  ;;  %p454_p12 = pnand %p453_p11, %p447_p8 }
  0x25   :  { %154 = vperm.xlu1 %416, %v151_v10  }
  0x29   :  { %418 = vset.pattern.permute.xlu1 %v478_v13 }
  0x2a   :  { %165 = vperm.xlu1 %418, %v151_v10  }
  0x2e   :  { %159 = vperm.xlu0 %417, %v151_v10  }
  0x32   :  { %419 = vset.pattern.permute.xlu0 %v478_v13 }
  0xa1   :  { %v43_v14 = vpop.xlane.xlu0 %42  ;;  %v62_v18 = vpop.xlane.xlu1 %61 }
  0xa2   :  { %v48_v20 = vmul.f32 %v359_v15, %v43_v14  ;;  %v67_v22 = vmul.f32 %v361_v17, %v62_v18 }
  0xa5   :  { %v52_v19 = vpop.xlane.xlu0 %51  ;;  %v155_v32 = vpop.permute.xlu1 %154 }
  0xa6   :  { %v57_v21 = vmul.f32 %v360_v16, %v52_v19  ;;  %v157_v34 = vmul.f32 %v359_v15, %v155_v32 }
  0xa8   :  { %v58_v23 = vadd.f32 %v57_v21, %v48_v20 }
  0xa9   :  { %v166_v36 = vpop.permute.xlu1 %165 }
  0xaa   :  { %v68_v24 = vadd.f32 %v67_v22, %v58_v23  ;;  %v168_v39 = vmul.f32 %v361_v17, %v166_v36 }
  0xac   :  { %v69_v25 = vsub.f32 %v33_v0, %v68_v24 }
  0xad   :  { %v160_v33 = vpop.permute.xlu0 %159 }
  0xae   :  { %v70_v26 = vmul.f32 1.442695, %v69_v25  ;;  %v162_v35 = vmul.f32 %v360_v16, %v160_v33 }
  0xb0   :  { %420 = vpow2.f32 %v70_v26  ;;  %v163_v38 = vadd.f32 %v162_v35, %v157_v34 }
  0xb2   :  { %v169_v41 = vadd.f32 %v168_v39, %v163_v38 }
  0xb4   :  { %vm174_vm5 = vcmp.eq.f32.partialorder %v363_v42, %v169_v41 }
  0xb5   :  { %v364_v44 = vsel %vm174_vm5, 1.0, %v475_v8 }
  0xb6   :  { %v178_v46 = vmul.f32 0.99999, %v364_v44 }
  0xba   :  { %v421_v27 = vpop.eup %420 }
  0xbb   :  { %386 = vmatmul.mubr.msk.f32.vlgmr.msra.gmra.mrb[0].mxu0 %vm75_vm4, %v421_v27 }
  0xbc   :  { %399 = vmatprep.mubr.msk.f32.mxu0 %vm474_vm3, %v475_v8 }
 0x18e   :  { %v145_v37 = vpop.f32.mrb[0].mxu0 }
 0x18f   :  { %422 = vrcp.f32 %v145_v37  ;;  %v387_v40 = vpop.f32.mrb[1].mxu0 }
 0x199   :  { %v423_v43 = vpop.eup %422 }
 0x19a   :  { %v150_v45 = vmul.f32 %v423_v43, %v421_v27 }
 0x19c   :  { %v177_v47 = vmul.f32 0.99999, %v150_v45  ;;  %v262_v49 = vsub.f32 %v150_v45, %v364_v44 }
 0x19e   :  { %v179_v48 = vsub.f32 %v177_v47, %v178_v46  ;;  %v263_v50 = vmul.f32 %v262_v49, %v262_v49 }
 0x1a0   :  { %395 = vmatmul.mubr.msk.f32.vlgmr.msra.gmra.mrb[0].mxu1 %vm75_vm4, %v179_v48  ;;  %v264_v56 = vmul.f32 0.125, %v263_v50 }
 0x273   :  { %v252_v52 = vpop.f32.mrb[0].mxu1 }
 0x274   :  { %v256_v53 = vmul.f32 %v252_v52, %v252_v52  ;;  %v396_v54 = vpop.f32.mrb[1].mxu1 }
 0x276   :  { %v261_v55 = vmul.f32 %v366_v51, %v256_v53 }
 0x278   :  { %v265_v57 = vadd.f32 %v264_v56, %v261_v55 }
 0x27a   :  { %398 = vmatpush3.xpose.msk.msra.mxu0 %vm75_vm4, %v265_v57 }
 0x27d   :  { %400 = vmatmul.mubr.msk.f32.vlgmr.msra.gmra.mrb[2].mxu0 %vm75_vm4, %v35_v58 }
 0x350   :  { %v338_v59 = vpop.f32.mrb[2].mxu0 }
 0x351   :  { %v401_v60 = vpop.f32.mrb[3].mxu0  ;;  %343 = vst.msk [vmem:[#allocation5] sm:$0x1] %vm342_vm6, %v338_v59 }
 0x352   :  { %457 = shalt.err (!%p454_p12)
}
 0x353   :  { %s458_s2 = scalar_lea.hbm %s585_s5, 16 }
 0x354   :  { %p459_p13 = scmp.ne.s32.totalorder %s585_s5, %s458_s2  ;;  %p462_p0 = scmp.lt.u32.totalorder %s458_s2, %s585_s5 }
 0x356   :  { %p464_p1 = pnand %p462_p0, %p459_p13 }
 0x358   :  { %467 = shalt.err (!%p464_p1)
}
 0x359   :  { %353 = dma.vmem_to_hbm [thread:$0]  %s351_s28, 16, %s585_s5, [#allocation4]  }
 0x35a   :  { %470 = dma.done.wait [#allocation4], 16  }
 0x35b   :  { %471 = vsyncadd [#allocation4], 4294967280 }
 0x35c   :  { %357 = vsyncpa [#allocation3], 1 }
 0x35d   :  { %358 = vsyncpa [#allocation4], 1 }

</bundles_post_ra>
